<compile_context>
chip_gen: v7x
topology: tpu7x:2x2x1
jax: 0.10.0
libtpu: 0.0.40
codegen_flags: <defaults>
</compile_context>

<pallas_src>
import functools

import jax
import jax.numpy as jnp
from jax.experimental import pallas as pl
from jax.experimental.pallas import tpu as pltpu


def _custom_scalar_kernel(x_ref, o_ref, *, r, s):
    # Elementwise hot path: one add + one mul on the VPU per element.
    o_ref[...] = ((x_ref[...] + r) * s).astype(o_ref.dtype)


_LANE_CANDIDATES = (4096, 2048, 1024, 512, 256, 128)
_MIN_GRID_STEPS = 8                      # enough steps for DMA overlap + 2-TC split
_FORCE_SPLIT_MIN_BYTES = 2 * 1024 * 1024  # only force-split tensors >= 2 MiB


def _round_down(a, m):
    return (a // m) * m


def _sublane_multiple(dtype):
    itemsize = jnp.dtype(dtype).itemsize
    if itemsize >= 4:
        return 8
    if itemsize == 2:
        return 16
    return 32


@functools.lru_cache(maxsize=None)
def _vmem_budget():
    """(target block bytes per buffer, scoped VMEM limit) tuned per chip generation."""
    target, limit = 4 * 1024 * 1024, 32 * 1024 * 1024       # v7x-safe default
    try:
        cap = pltpu.get_tpu_info().vmem_capacity_bytes
        if cap is not None and cap >= 100 * 1024 * 1024:     # v5e / v6e (128 MiB VMEM)
            target, limit = 8 * 1024 * 1024, 64 * 1024 * 1024
    except Exception:
        pass
    return target, limit


def _flat_2d_factorization(n):
    """Zero-copy (rows, cols) factorization of the flat element count (no pad, no slice)."""
    for cand in _LANE_CANDIDATES:            # lane-dense fast path (n % 128 == 0)
        if n % cand == 0:
            return n // cand, cand
    # Ragged total size: take the largest divisor of n up to 4096 as the lane extent.
    # The block uses the FULL lane dim, so this stays a single HBM pass with no padding.
    for d in range(min(n, 4096), 0, -1):
        if n % d == 0:
            return n // d, d
    return n, 1  # unreachable


def custom_scalar(x, r, s, *, donate_x=False):
    """y = (x + r) * s, matching CustomScalarImply.forward (PyTorch promotion for ints)."""
    orig_shape = x.shape
    in_dtype = x.dtype
    out_dtype = in_dtype if jnp.issubdtype(in_dtype, jnp.floating) else jnp.float32
    n = x.size
    if n == 0:
        return ((x + float(r)) * float(s)).astype(out_dtype)

    # --- Zero-copy 2D view of the row-major flat data. ---
    rows, cols = _flat_2d_factorization(n)
    x2d = jnp.reshape(x, (rows, cols))       # metadata-only for contiguous arrays

    blk_item = max(jnp.dtype(in_dtype).itemsize, jnp.dtype(out_dtype).itemsize)
    sub = max(_sublane_multiple(in_dtype), _sublane_multiple(out_dtype))
    target_bytes, vmem_limit = _vmem_budget()

    # --- Lane (column) blocking: full extent when it fits, else a 128-multiple block
    #     with a masked partial final block (no wrapper-side padding either way). ---
    max_bc = max(128, _round_down(target_bytes // (blk_item * sub), 128))
    bc = cols if cols <= max_bc else max_bc

    # --- Sublane (row) blocking: big blocks, but keep >= ~8 grid steps on mid/large
    #     tensors so the pipeline overlaps and v7x's two TensorCores both get work. ---
    cap_rows = max(sub, _round_down(max(sub, target_bytes // (bc * blk_item)), sub))
    if n * blk_item >= _FORCE_SPLIT_MIN_BYTES and rows >= _MIN_GRID_STEPS * sub:
        block_rows = min(cap_rows,
                         max(sub, _round_down(pl.cdiv(rows, _MIN_GRID_STEPS), sub)))
    else:
        block_rows = min(rows, cap_rows)      # full row extent (always legal) or cap

    grid = (pl.cdiv(rows, block_rows), pl.cdiv(cols, bc))
    kernel = functools.partial(_custom_scalar_kernel, r=float(r), s=float(s))

    aliases = {0: 0} if (donate_x and out_dtype == in_dtype) else {}

    # TODO(synk): confirm on v7x (xprof) that the "parallel" grid axes shard across both
    # TensorCores; if a single TC is busy, add an explicit CORE_PARALLEL leading axis.
    y2d = pl.pallas_call(
        kernel,
        out_shape=jax.ShapeDtypeStruct((rows, cols), out_dtype),
        grid=grid,
        in_specs=[pl.BlockSpec((block_rows, bc), lambda i, j: (i, j))],
        out_specs=pl.BlockSpec((block_rows, bc), lambda i, j: (i, j)),
        input_output_aliases=aliases,
        compiler_params=pltpu.CompilerParams(
            dimension_semantics=("parallel", "parallel"),
            vmem_limit_bytes=vmem_limit,
        ),
    )(x2d)

    return y2d.reshape(orig_shape)


if __name__ == "__main__":
    # Deterministic scalar parameters (module __init__ takes r, s).
    r = 0.5
    s = 2.0

    # Primary shape implied by the module's export test.
    x = jax.random.normal(jax.random.PRNGKey(0), (2, 4, 16, 16), dtype=jnp.float32)
    y = custom_scalar(x, r, s)
    jax.block_until_ready(y)
    assert y.shape == x.shape and y.dtype == x.dtype
    assert jnp.allclose(y, (x + r) * s, atol=1e-6), "mismatch vs reference"

    # Ragged total size (not divisible by 128): zero-copy single-pass path, no pad/slice.
    x2 = jax.random.normal(jax.random.PRNGKey(1), (3, 5, 7), dtype=jnp.float32)
    y2 = custom_scalar(x2, r, s)
    jax.block_until_ready(y2)
    assert jnp.allclose(y2, (x2 + r) * s, atol=1e-6), "mismatch on ragged shape"

    # Multi-step grid with a partial final row block + input donation.
    x3 = jax.random.normal(jax.random.PRNGKey(2), (16, 256, 130), dtype=jnp.float32)
    ref3 = (x3 + r) * s
    y3 = custom_scalar(x3, r, s, donate_x=True)
    jax.block_until_ready(y3)
    assert jnp.allclose(y3, ref3, atol=1e-6), "mismatch on multi-step/donated path"

    # Integer input follows PyTorch promotion: (int + 0.5) * 2.0 -> float32.
    x4 = jax.random.randint(jax.random.PRNGKey(3), (4, 33), -5, 5, dtype=jnp.int32)
    y4 = custom_scalar(x4, r, s)
    jax.block_until_ready(y4)
    assert y4.dtype == jnp.float32
    assert jnp.allclose(y4, (x4.astype(jnp.float32) + r) * s, atol=1e-6), "int promotion mismatch"

    print("KERNEL_OK")
</pallas_src>

<mosaic_0001>
module attributes {stable_mosaic.version = 11 : i64} {
  func.func @_custom_scalar_kernel(%arg0: i32, %arg1: i32, %arg2: memref<1x2048xf32, #tpu.memory_space<vmem>>, %arg3: memref<1x2048xf32, #tpu.memory_space<vmem>>) attributes {dimension_semantics = [#tpu.dimension_semantics<parallel>, #tpu.dimension_semantics<parallel>], iteration_bounds = array<i64: 1, 1>, scalar_prefetch = 0 : i64, scratch_operands = 0 : i64, tpu.core_type = #tpu.core_type<tc>, window_params = [{transform_indices = @transform_0, window_bounds = array<i64: 1, 2048>}, {transform_indices = @transform_1, window_bounds = array<i64: 1, 2048>}]} {
    %c0 = arith.constant 0 : index
    %c0_0 = arith.constant 0 : index
    %0 = vector.load %arg2[%c0, %c0_0] : memref<1x2048xf32, #tpu.memory_space<vmem>>, vector<1x2048xf32>
    %cst = arith.constant 5.000000e-01 : f32
    %1 = vector.broadcast %cst : f32 to vector<1x2048xf32>
    %2 = arith.addf %0, %1 : vector<1x2048xf32>
    %cst_1 = arith.constant 2.000000e+00 : f32
    %3 = vector.broadcast %cst_1 : f32 to vector<1x2048xf32>
    %4 = arith.mulf %2, %3 : vector<1x2048xf32>
    %c0_2 = arith.constant 0 : index
    %c0_3 = arith.constant 0 : index
    %5 = vector.load %arg3[%c0_2, %c0_3] : memref<1x2048xf32, #tpu.memory_space<vmem>>, vector<1x2048xf32>
    tpu.vector_store %arg3[%c0_2, %c0_3], %4 {strides = array<i32>} : memref<1x2048xf32, #tpu.memory_space<vmem>>, vector<1x2048xf32>,
    return
  }
  func.func @transform_0(%arg0: i32, %arg1: i32) -> (i32, i32) {
    %c0_i32 = arith.constant 0 : i32
    return %arg0, %arg1 : i32, i32
  }
  func.func @transform_1(%arg0: i32, %arg1: i32) -> (i32, i32) {
    %c0_i32 = arith.constant 0 : i32
    return %arg0, %arg1 : i32, i32
  }
}

</mosaic_0001>

<bundles_post_ra>
// kernel: tpu_custom_call.1
= control target key start
LH: loop header
LB: loop body
LE: loop exit
PB: predicated region body
PF: predicated region fallthrough
CT: control target
= control target key end

     0   :  { %6 = vsyncpa [#allocation3], 0  ;;  %s130_s0 = inlined_call_operand.hbm [shape: f32[1,2048], index: 0, kind: input, shape index: {}]   ;;  %s131_s1 = inlined_call_operand.hbm [shape: f32[1,2048], index: 1, kind: output, shape index: {}]  }
   0x1   :  { %7 = vsyncpa [#allocation4], 0  ;;  %s94_s6 = smov [#allocation2]   ;;  %s46_s10 = scalar_lea.hbm %s130_s0, 256 }
   0x2   :  { %s14_s7 = sshll.u32 %s94_s6, 4  ;;  %p47_p0 = scmp.ne.s32.totalorder %s130_s0, %s46_s10  ;;  %s15_s7 = int_to_ptr.vmem [resolvable:$true] %s14_s7 }
   0x3   :  { %p50_p1 = scmp.lt.u32.totalorder %s46_s10, %s130_s0 }
   0x5   :  { %p52_p2 = pnand %p50_p1, %p47_p0 }
   0x7   :  { %55 = shalt.err (!%p52_p2)
}
   0x8   :  { %s56_s15 = scalar_lea.vmem %s15_s7, 256  ;;  %p61_p4 = scmp.lt.s32.totalorder %s15_s7, %s15_s7 }
   0x9   :  { %p57_p3 = scmp.ne.s32.totalorder %s15_s7, %s56_s15  ;;  %p62_p5 = scmp.lt.s32.totalorder %s56_s15, %s56_s15 }
   0xb   :  { %p63_p6 = por %p62_p5, %p61_p4 }
   0xd   :  { %p64_p7 = pnand %p63_p6, %p57_p3 }
   0xf   :  { %67 = shalt.err (!%p64_p7)
}
  0x10   :  { %17 = dma.hbm_to_vmem [thread:$0]  %s130_s0, 256, %s15_s7, [#allocation3]  }
  0x11   :  { %90 = dma.done.wait [#allocation3], 256  }
  0x12   :  { %91 = vsyncadd [#allocation3], 4294967040  ;;  %v21_v0 = vld [vmem:[#allocation2] sm:$0xff]  ;;  %v22_v1 = vld [vmem:[#allocation2 + $0x8] sm:$0xff]  ;;  %s95_s18 = smov [#allocation5]  }
  0x13   :  { %s35_s19 = sshll.u32 %s95_s18, 4  ;;  %v23_v2 = vadd.f32 0.5, %v21_v0  ;;  %v24_v3 = vadd.f32 0.5, %v22_v1  ;;  %s36_s19 = int_to_ptr.vmem [resolvable:$true] %s35_s19 }
  0x14   :  { %s68_s20 = scalar_lea.vmem %s36_s19, 256  ;;  %p73_p9 = scmp.lt.s32.totalorder %s36_s19, %s36_s19 }
  0x15   :  { %v25_v4 = vmul.f32 2.0, %v23_v2  ;;  %v26_v5 = vmul.f32 2.0, %v24_v3  ;;  %p69_p8 = scmp.ne.s32.totalorder %s36_s19, %s68_s20  ;;  %p74_p10 = scmp.lt.s32.totalorder %s68_s20, %s68_s20 }
  0x17   :  { %27 = vst [vmem:[#allocation5] sm:$0xff] %v25_v4  ;;  %28 = vst [vmem:[#allocation5 + $0x8] sm:$0xff] %v26_v5  ;;  %p75_p11 = por %p74_p10, %p73_p9 }
  0x19   :  { %p76_p12 = pnand %p75_p11, %p69_p8 }
  0x1b   :  { %79 = shalt.err (!%p76_p12)
}
  0x1c   :  { %s80_s22 = scalar_lea.hbm %s131_s1, 256 }
  0x1d   :  { %p81_p13 = scmp.ne.s32.totalorder %s131_s1, %s80_s22  ;;  %p84_p0 = scmp.lt.u32.totalorder %s80_s22, %s131_s1 }
  0x1f   :  { %p86_p1 = pnand %p84_p0, %p81_p13 }
  0x21   :  { %89 = shalt.err (!%p86_p1)
}
  0x22   :  { %38 = dma.vmem_to_hbm [thread:$0]  %s36_s19, 256, %s131_s1, [#allocation4]  }
  0x23   :  { %92 = dma.done.wait [#allocation4], 256  }
  0x24   :  { %93 = vsyncadd [#allocation4], 4294967040 }
  0x25   :  { %42 = vsyncpa [#allocation3], 1 }
  0x26   :  { %43 = vsyncpa [#allocation4], 1 }

</bundles_post_ra>
